<compile_context>
chip_gen: v5e
topology: v5e:2x2
jax: 0.10.0
libtpu: 0.0.40
codegen_flags: <defaults>
</compile_context>

<pallas_src>
import jax
import jax.numpy as jnp
from jax.experimental import pallas as pl
from jax.experimental.pallas import tpu as pltpu

_NEG_BIG = -1e30   # finite "-inf" used for masked classes (avoids inf*0 = NaN)
_LANES = 128


def _round_up(n, m):
    return ((n + m - 1) // m) * m


def _cdiv(a, b):
    return (a + b - 1) // b


def _tpu_vmem_capacity_bytes():
    """Physical VMEM per core, with a conservative (v7x-sized) fallback."""
    try:
        info = pltpu.get_tpu_info()
        cap = getattr(info, "vmem_capacity_bytes", None)
        if cap:
            return int(cap)
    except Exception:
        pass
    return 64 * 1024 * 1024


# ----------------------------------------------------------------------------- kernels
def _ce_single_tile_kernel(x_ref, t_ref, loss_ref):
    """Whole class axis in one tile: direct logsumexp, no accumulators."""
    x = x_ref[...].astype(jnp.float32)
    t = t_ref[...].astype(jnp.float32)
    m = jnp.max(x, axis=1, keepdims=True)
    lse = m + jnp.log(jnp.sum(jnp.exp(x - m), axis=1, keepdims=True))
    ts = jnp.sum(t, axis=1, keepdims=True)
    tx = jnp.sum(t * x, axis=1, keepdims=True)
    loss_ref[...] = lse * ts - tx


def _make_streaming_kernel(num_classes, block_c, num_class_tiles):
    """Class axis streamed over `num_class_tiles` tiles with per-lane accumulators."""
    assert block_c % _LANES == 0
    ragged = (num_classes % block_c) != 0
    rem = num_classes - (num_class_tiles - 1) * block_c   # valid cols in last tile
    nchunk = block_c // _LANES

    def kernel(x_ref, t_ref, loss_ref, m_acc, l_acc, ts_acc, tx_acc):
        ci = pl.program_id(1)

        @pl.when(ci == 0)
        def _init():
            m_acc[...] = jnp.full_like(m_acc, _NEG_BIG)
            l_acc[...] = jnp.zeros_like(l_acc)
            ts_acc[...] = jnp.zeros_like(ts_acc)
            tx_acc[...] = jnp.zeros_like(tx_acc)

        def accumulate(x, t):
            # Per-lane online logsumexp + per-lane sums: VPU/EUP only, no cross-lane
            # work and no (bb,1) lane-broadcast inside the hot loop.
            tile_max = x[:, 0:_LANES]
            for j in range(1, nchunk):
                tile_max = jnp.maximum(tile_max, x[:, j * _LANES:(j + 1) * _LANES])
            m_prev = m_acc[...]
            m_new = jnp.maximum(m_prev, tile_max)
            l_new = l_acc[...] * jnp.exp(m_prev - m_new)
            ts_new = ts_acc[...]
            tx_new = tx_acc[...]
            for j in range(nchunk):
                xj = x[:, j * _LANES:(j + 1) * _LANES]
                tj = t[:, j * _LANES:(j + 1) * _LANES]
                l_new = l_new + jnp.exp(xj - m_new)
                ts_new = ts_new + tj
                tx_new = tx_new + tj * xj
            m_acc[...] = m_new
            l_acc[...] = l_new
            ts_acc[...] = ts_new
            tx_acc[...] = tx_new

        if ragged:
            # Only the last class tile pays for masking; full tiles take the plain path.
            @pl.when(ci < num_class_tiles - 1)
            def _full_tile():
                accumulate(x_ref[...].astype(jnp.float32),
                           t_ref[...].astype(jnp.float32))

            @pl.when(ci == num_class_tiles - 1)
            def _tail_tile():
                x = x_ref[...].astype(jnp.float32)
                t = t_ref[...].astype(jnp.float32)
                lane = jax.lax.broadcasted_iota(jnp.int32, x.shape, 1)
                valid = lane < rem
                accumulate(jnp.where(valid, x, _NEG_BIG),
                           jnp.where(valid, t, 0.0))
        else:
            accumulate(x_ref[...].astype(jnp.float32),
                       t_ref[...].astype(jnp.float32))

        @pl.when(ci == num_class_tiles - 1)
        def _finalize():
            # Single cross-lane reduce per batch tile.
            m_lane = m_acc[...]
            m_row = jnp.max(m_lane, axis=1, keepdims=True)
            l_row = jnp.sum(l_acc[...] * jnp.exp(m_lane - m_row),
                            axis=1, keepdims=True)
            lse = m_row + jnp.log(l_row)
            ts_row = jnp.sum(ts_acc[...], axis=1, keepdims=True)
            tx_row = jnp.sum(tx_acc[...], axis=1, keepdims=True)
            loss_ref[...] = lse * ts_row - tx_row

    return kernel


# ----------------------------------------------------------------------------- wrapper
def cross_entropy_feature_aug(inputs, targets, reduction=True,
                              block_b=None, block_c=None):
    """inputs: (B, C) logits; targets: (B, C) soft labels.

    Returns scalar mean loss (reduction=True) or per-sample (B,) losses.
    """
    B, C = inputs.shape
    assert targets.shape == (B, C)

    in_itemsize = inputs.dtype.itemsize + targets.dtype.itemsize
    # Sub-32-bit dtypes pack rows along sublanes: 16-row tiles for bf16, 32 for int8.
    row_align = max(8, 32 // inputs.dtype.itemsize, 32 // targets.dtype.itemsize)

    # ---- generation-aware VMEM budget / tile caps ---------------------------------
    vmem_cap = _tpu_vmem_capacity_bytes()
    vmem_limit = int(min(96 * 1024 * 1024,
                         max(16 * 1024 * 1024, (vmem_cap * 5) // 8)))
    if vmem_cap >= 96 * 1024 * 1024:       # v5e / v6e: 128 MiB VMEM, 1 TensorCore
        block_c_max, block_b_max = 8192, 512
        want_two_batch_tiles = False
    else:                                  # v7x (64 MiB / TC, 2 TCs) or unknown
        block_c_max, block_b_max = 4096, 256
        want_two_batch_tiles = True

    # ---- class tiling --------------------------------------------------------------
    if block_c is None:
        block_c = C if C <= block_c_max else block_c_max
    if block_c >= C:
        block_c = C                        # single class tile (full-dim block is legal)
    else:
        assert block_c % _LANES == 0, "streamed class tiles must be multiples of 128"
    single_class_tile = (block_c == C)
    num_ct = _cdiv(C, block_c)

    # ---- batch tiling (double-buffered input bytes/row = 2 * block_c * itemsize) ---
    input_budget = (vmem_limit * 3) // 4
    if block_b is None:
        rows = input_budget // (2 * block_c * in_itemsize)
        rows = max(row_align, (rows // row_align) * row_align)
        block_b = int(min(rows, block_b_max))
        if block_b >= B:
            block_b = B
            # v7x megacore: make sure the "parallel" batch axis has >= 2 tiles.
            if want_two_batch_tiles and B >= 2 * row_align:
                block_b = _round_up(_cdiv(B, 2), row_align)
                if block_b >= B:
                    block_b = B
    else:
        block_b = int(min(block_b, B))
    assert block_b == B or block_b % 8 == 0, "batch tile must be 8-aligned or full"
    num_bt = _cdiv(B, block_b)

    out_shape = jax.ShapeDtypeStruct((B, 1), jnp.float32)

    if single_class_tile:
        kernel = _ce_single_tile_kernel
        grid = (num_bt,)
        in_specs = [pl.BlockSpec((block_b, C), lambda bi: (bi, 0)),
                    pl.BlockSpec((block_b, C), lambda bi: (bi, 0))]
        out_specs = pl.BlockSpec((block_b, 1), lambda bi: (bi, 0))
        scratch_shapes = []
        dim_sem = ("parallel",)
    else:
        kernel = _make_streaming_kernel(C, block_c, num_ct)
        grid = (num_bt, num_ct)
        in_specs = [pl.BlockSpec((block_b, block_c), lambda bi, ci: (bi, ci)),
                    pl.BlockSpec((block_b, block_c), lambda bi, ci: (bi, ci))]
        out_specs = pl.BlockSpec((block_b, 1), lambda bi, ci: (bi, 0))
        scratch_shapes = [
            pltpu.VMEM((block_b, _LANES), jnp.float32),   # per-lane running max
            pltpu.VMEM((block_b, _LANES), jnp.float32),   # per-lane running sum exp
            pltpu.VMEM((block_b, _LANES), jnp.float32),   # per-lane sum_c(t)
            pltpu.VMEM((block_b, _LANES), jnp.float32),   # per-lane sum_c(t * x)
        ]
        dim_sem = ("parallel", "arbitrary")

    out = pl.pallas_call(
        kernel,
        out_shape=out_shape,
        grid_spec=pltpu.PrefetchScalarGridSpec(
            num_scalar_prefetch=0,
            grid=grid,
            in_specs=in_specs,
            out_specs=out_specs,
            scratch_shapes=scratch_shapes,
        ),
        compiler_params=pltpu.CompilerParams(
            dimension_semantics=dim_sem,
            vmem_limit_bytes=vmem_limit,
        ),
    )(inputs, targets)

    per_sample = out[:, 0]
    if reduction:
        return jnp.sum(per_sample) / B
    return per_sample


# ----------------------------------------------------------------------------- demo
if __name__ == "__main__":
    key = jax.random.PRNGKey(0)
    k1, k2, k3, k4, k5, k6 = jax.random.split(key, 6)
    eps = 0.1

    def _soft_targets(labels, num_classes, dtype=jnp.float32):
        return ((1.0 - eps) * jax.nn.one_hot(labels, num_classes, dtype=dtype)
                + eps / num_classes).astype(dtype)

    # Case 1: tiny shape -> single-class-tile fast path, single batch tile.
    B1, C1 = 8, 32
    x1 = jax.random.normal(k1, (B1, C1), dtype=jnp.float32)
    t1 = _soft_targets(jax.random.randint(k2, (B1,), 0, C1), C1)
    loss1 = jax.block_until_ready(cross_entropy_feature_aug(x1, t1))
    ref1 = jnp.mean(jnp.sum(-t1 * jax.nn.log_softmax(x1, axis=1), axis=1))
    assert jnp.allclose(loss1, ref1, rtol=1e-4, atol=1e-4), (loss1, ref1)

    # Case 2: streamed class tiles with a ragged tail + partial batch tile (no padding).
    B2, C2 = 20, 200
    x2 = jax.random.normal(k3, (B2, C2), dtype=jnp.float32)
    t2 = _soft_targets(jax.random.randint(k4, (B2,), 0, C2), C2)
    loss2 = jax.block_until_ready(
        cross_entropy_feature_aug(x2, t2, block_b=8, block_c=128))
    per2 = jax.block_until_ready(
        cross_entropy_feature_aug(x2, t2, reduction=False, block_b=8, block_c=128))
    ref_per2 = jnp.sum(-t2 * jax.nn.log_softmax(x2, axis=1), axis=1)
    assert jnp.allclose(loss2, jnp.mean(ref_per2), rtol=1e-4, atol=1e-4), (loss2,)
    assert jnp.allclose(per2, ref_per2, rtol=1e-4, atol=1e-4)

    # Case 3: bf16 inputs (half the HBM traffic; in-kernel f32 upcast), 3 class tiles.
    B3, C3 = 16, 384
    x3 = jax.random.normal(k5, (B3, C3), dtype=jnp.float32).astype(jnp.bfloat16)
    t3 = _soft_targets(jax.random.randint(k6, (B3,), 0, C3), C3, dtype=jnp.bfloat16)
    loss3 = jax.block_until_ready(
        cross_entropy_feature_aug(x3, t3, block_b=16, block_c=128))
    x3f, t3f = x3.astype(jnp.float32), t3.astype(jnp.float32)
    ref3 = jnp.mean(jnp.sum(-t3f * jax.nn.log_softmax(x3f, axis=1), axis=1))
    assert jnp.allclose(loss3, ref3, rtol=1e-3, atol=1e-3), (loss3, ref3)

    print("KERNEL_OK")
</pallas_src>

<mosaic_0001>
module attributes {stable_mosaic.version = 11 : i64} {
  func.func @_ce_single_tile_kernel(%arg0: i32, %arg1: memref<8x32xf32, #tpu.memory_space<vmem>>, %arg2: memref<8x32xf32, #tpu.memory_space<vmem>>, %arg3: memref<8x1xf32, #tpu.memory_space<vmem>>) attributes {dimension_semantics = [#tpu.dimension_semantics<parallel>], iteration_bounds = array<i64: 1>, scalar_prefetch = 0 : i64, scratch_operands = 0 : i64, tpu.core_type = #tpu.core_type<tc>, window_params = [{transform_indices = @transform_0, window_bounds = array<i64: 8, 32>}, {transform_indices = @transform_1, window_bounds = array<i64: 8, 32>}, {transform_indices = @transform_2, window_bounds = array<i64: 8, 1>}]} {
    %c0 = arith.constant 0 : index
    %c0_0 = arith.constant 0 : index
    %0 = vector.load %arg1[%c0, %c0_0] : memref<8x32xf32, #tpu.memory_space<vmem>>, vector<8x32xf32>
    %c0_1 = arith.constant 0 : index
    %c0_2 = arith.constant 0 : index
    %1 = vector.load %arg2[%c0_1, %c0_2] : memref<8x32xf32, #tpu.memory_space<vmem>>, vector<8x32xf32>
    %cst = arith.constant dense<0xFF800000> : vector<8xf32>
    %2 = vector.multi_reduction <maximumf>, %0, %cst [1] : vector<8x32xf32> to vector<8xf32>
    %3 = vector.shape_cast %2 : vector<8xf32> to vector<8x1xf32>
    %4 = vector.broadcast %3 : vector<8x1xf32> to vector<8x32xf32>
    %5 = arith.subf %0, %4 : vector<8x32xf32>
    %6 = math.exp %5 : vector<8x32xf32>
    %cst_3 = arith.constant dense<0.000000e+00> : vector<8xf32>
    %7 = vector.multi_reduction <add>, %6, %cst_3 [1] : vector<8x32xf32> to vector<8xf32>
    %8 = vector.shape_cast %7 : vector<8xf32> to vector<8x1xf32>
    %9 = math.log %8 : vector<8x1xf32>
    %10 = arith.addf %3, %9 : vector<8x1xf32>
    %cst_4 = arith.constant dense<0.000000e+00> : vector<8xf32>
    %11 = vector.multi_reduction <add>, %1, %cst_4 [1] : vector<8x32xf32> to vector<8xf32>
    %12 = vector.shape_cast %11 : vector<8xf32> to vector<8x1xf32>
    %13 = arith.mulf %1, %0 : vector<8x32xf32>
    %cst_5 = arith.constant dense<0.000000e+00> : vector<8xf32>
    %14 = vector.multi_reduction <add>, %13, %cst_5 [1] : vector<8x32xf32> to vector<8xf32>
    %15 = vector.shape_cast %14 : vector<8xf32> to vector<8x1xf32>
    %16 = arith.mulf %10, %12 : vector<8x1xf32>
    %17 = arith.subf %16, %15 : vector<8x1xf32>
    %c0_6 = arith.constant 0 : index
    %c0_7 = arith.constant 0 : index
    %18 = vector.load %arg3[%c0_6, %c0_7] : memref<8x1xf32, #tpu.memory_space<vmem>>, vector<8x1xf32>
    tpu.vector_store %arg3[%c0_6, %c0_7], %17 {strides = array<i32>} : memref<8x1xf32, #tpu.memory_space<vmem>>, vector<8x1xf32>,
    return
  }
  func.func @transform_0(%arg0: i32) -> (i32, i32) {
    %c0_i32 = arith.constant 0 : i32
    %c0_i32_0 = arith.constant 0 : i32
    return %arg0, %c0_i32 : i32, i32
  }
  func.func @transform_1(%arg0: i32) -> (i32, i32) {
    %c0_i32 = arith.constant 0 : i32
    %c0_i32_0 = arith.constant 0 : i32
    return %arg0, %c0_i32 : i32, i32
  }
  func.func @transform_2(%arg0: i32) -> (i32, i32) {
    %c0_i32 = arith.constant 0 : i32
    %c0_i32_0 = arith.constant 0 : i32
    return %arg0, %c0_i32 : i32, i32
  }
}

</mosaic_0001>

<bundles_post_ra>
// kernel: tpu_custom_call.1
= control target key start
LH: loop header
LB: loop body
LE: loop exit
PB: predicated region body
PF: predicated region fallthrough
CT: control target
= control target key end

     0   :  { %7 = vsyncpa [#allocation3], 0  ;;  %s155_s0 = inlined_call_operand.hbm [shape: f32[8,32], index: 0, kind: input, shape index: {}]   ;;  %s156_s1 = inlined_call_operand.hbm [shape: f32[8,32], index: 1, kind: input, shape index: {}]   ;;  %s157_s2 = inlined_call_operand.vmem [shape: f32[8,1], index: 2, kind: output, shape index: {}]  }
   0x1   :  { %s14_s11 = sshll.u32 %s155_s0, 4  ;;  %s15_s11 = int_to_ptr.hbm [resolvable:$true] %s14_s11 }
   0x2   :  { %8 = vsyncpa [#allocation5], 0  ;;  %s129_s12 = smov [#allocation2]   ;;  %s25_s16 = sshll.u32 %s156_s1, 4  ;;  %s26_s16 = int_to_ptr.hbm [resolvable:$true] %s25_s16 }
   0x3   :  { %s16_s13 = sshll.u32 %s129_s12, 4  ;;  %s130_s17 = smov [#allocation4]   ;;  %s17_s13 = int_to_ptr.vmem [resolvable:$true] %s16_s13 }
   0x4   :  { %19 = dma.hbm_to_vmem [thread:$0]  %s15_s11, 128, %s17_s13, [#allocation3]  }
   0x5   :  { %s27_s18 = sshll.u32 %s130_s17, 4  ;;  %s28_s18 = int_to_ptr.vmem [resolvable:$true] %s27_s18 }
   0x6   :  { %30 = dma.hbm_to_vmem [thread:$0]  %s26_s16, 128, %s28_s18, [#allocation5]  }
   0x7   :  { %125 = dma.done.wait [#allocation3], 128  }
   0x8   :  { %126 = vsyncadd [#allocation3], 4294967168 }
   0x9   :  { %127 = dma.done.wait [#allocation5], 128  }
   0xa   :  { %128 = vsyncadd [#allocation5], 4294967168  ;;  %vm41_vm0 = vcmask 261120   ;;  %v39_v0 = vld [vmem:[#allocation2] sm:$0xff]  ;;  %v40_v2 = vld [vmem:[#allocation4] sm:$0xff]  ;;  %vm63_vm1 = vcmask 7168  }
   0xb   :  { %v42_v1 = vsel %vm41_vm0, %v39_v0, -inf  ;;  %v54_v3 = vsel %vm41_vm0, %v40_v2, 0.0  ;;  %v57_v4 = vmul.f32 %v40_v2, %v39_v0 }
   0xc   :  { %43 = vmax.xlane.f32.xlu0 %v42_v1  ;;  %55 = vadd.xlane.f32.xlu1 %v54_v3 }
   0xd   :  { %v58_v5 = vsel %vm41_vm0, %v57_v4, 0.0 }
  0x14   :  { %59 = vadd.xlane.f32.xlu1 %v58_v5 }
  0x7f   :  { %v44_v6 = vpop.xlane.xlu0 %43  ;;  %v56_v12 = vpop.xlane.xlu1 %55 }
  0x80   :  { %v45_v7 = vsub.f32 %v39_v0, %v44_v6 }
  0x82   :  { %v46_v8 = vmul.f32 1.442695, %v45_v7 }
  0x84   :  { %73 = vpow2.f32 %v46_v8 }
  0x87   :  { %v60_v16 = vpop.xlane.xlu1 %59 }
  0x8a   :  { %v74_v9 = vpop.eup %73 }
  0x8b   :  { %v48_v10 = vsel %vm41_vm0, %v74_v9, 0.0 }
  0x8c   :  { %49 = vadd.xlane.f32.xlu0 %v48_v10 }
  0xff   :  { %v50_v11 = vpop.xlane.xlu0 %49 }
 0x100   :  { %75 = vlog2.f32 %v50_v11 }
 0x106   :  { %v76_v13 = vpop.eup %75 }
 0x107   :  { %v52_v14 = vmul.f32 0.6931472, %v76_v13 }
 0x109   :  { %v53_v15 = vadd.f32 %v52_v14, %v44_v6 }
 0x10b   :  { %v61_v17 = vmul.f32 %v56_v12, %v53_v15 }
 0x10d   :  { %v62_v18 = vsub.f32 %v61_v17, %v60_v16 }
 0x10f   :  { %64 = vst.msk [vmem:[%s157_s2] sm:$0xff] %vm63_vm1, %v62_v18 }
 0x110   :  { %69 = vsyncpa [#allocation3], 1 }
 0x111   :  { %70 = vsyncpa [#allocation5], 1 }

</bundles_post_ra>
